<compile_context>
chip_gen: v6e
topology: v6e:2x2x1
jax: 0.10.0
libtpu: 0.0.40
codegen_flags: <defaults>
</compile_context>

<pallas_src>
import functools

import jax
import jax.numpy as jnp
from jax.experimental import pallas as pl
from jax.experimental.pallas import tpu as pltpu


def _ms_sam_kernel(x_ref, w_ref, b_ref, o_ref, *, K, PAD):
    # x_ref: (NB, C, L) VMEM block (NB batch items per grid step)
    # w_ref: (2*K,) SMEM -- flattened Conv1d weight [out=1, in=2, K] -> [avg taps | max taps]
    # b_ref: (1,)   SMEM -- Conv1d bias
    x = x_ref[...]                                     # (NB, C, L) f32
    NB, C, L = x.shape
    inv_c = jnp.float32(1.0 / C)

    # Channel reductions (per batch item, per column): mean via sum * (1/C)
    # (guarantees a multiply, not a vector divide), max via XLU reduce.
    avg = jnp.sum(x, axis=1) * inv_c                   # (NB, L)
    mx = jnp.max(x, axis=1)                            # (NB, L)
    # Stack avg/max along sublanes so each conv tap needs a single lane-roll.
    pooled = jnp.concatenate([avg, mx], axis=0)        # (2*NB, L)

    idx = jax.lax.broadcasted_iota(jnp.int32, (1, L), 1)   # hoisted, reused per tap
    acc = jnp.full((NB, L), b_ref[0], dtype=jnp.float32)

    # Conv1d(2 -> 1, kernel K, stride 1, zero padding PAD), unrolled over taps:
    #   out[n, l] = b + sum_k w[0,k]*avg[n, l+k-PAD] + w[1,k]*mx[n, l+k-PAD]
    # (zero outside [0, L)).  One XLU roll of the stacked slab + masked VPU FMA
    # per tap; K is small and static so this fully unrolls.
    for k in range(K):
        d = k - PAD                                    # static input offset
        shift = (-d) % L                               # roll so column l holds in[l+d]
        rolled = pltpu.roll(pooled, shift=shift, axis=1)
        valid = jnp.logical_and(idx + d >= 0, idx + d < L)          # (1, L)
        contrib = w_ref[k] * rolled[:NB] + w_ref[K + k] * rolled[NB:]
        acc = acc + jnp.where(valid, contrib, jnp.float32(0.0))

    # sigmoid: exp on the EUP, divide replaced by EUP approx reciprocal
    # (frees the VALU slot for the broadcast multiply below).
    sam = pl.reciprocal(1.0 + jnp.exp(-acc), approx=True)           # (NB, L)

    o_ref[...] = x * sam[:, None, :]                   # broadcast over channels


def ms_sam_forward(x, weight, bias, kernel_size, pad, *, target_block_bytes=4 << 20):
    """x: (N, C, L) f32; weight: (1, 2, K) f32 (PyTorch Conv1d layout); bias: (1,) f32."""
    N, C, L = x.shape
    assert L + 2 * pad - kernel_size + 1 == L, "pad/kernel must preserve length"
    w_flat = weight.reshape(-1).astype(jnp.float32)    # (2*K,)  [avg taps, max taps]
    b = bias.astype(jnp.float32)

    # --- block sizing: batch NB items per grid step so each DMA block is a
    # few MiB (per-step overhead ~0.35us dominates tiny blocks), but keep at
    # least 2 grid steps so both v7x TensorCores get work via the parallel axis.
    bytes_per_item = C * L * 4
    nb = max(1, min(N, target_block_bytes // max(bytes_per_item, 1)))
    if N > 1:
        nb = min(nb, pl.cdiv(N, 2))
    grid = (pl.cdiv(N, nb),)

    # in + out blocks, double-buffered, plus headroom; stays well under v7x's
    # 64 MiB physical VMEM while allowing bigger blocks than the default
    # scoped limit would permit on v5e/v6e.
    block_vmem = 4 * nb * bytes_per_item
    vmem_limit = int(min(48 << 20, max(32 << 20, 2 * block_vmem)))

    # Pure bandwidth op: advise XLA so it can overlap with neighboring compute.
    cost = pl.CostEstimate(
        flops=3 * N * C * L + 4 * kernel_size * N * L,
        transcendentals=N * L,
        bytes_accessed=2 * N * C * L * 4,
    )

    # TODO(synk): for very large C*L per item, add an L-tiling grid axis with a
    # PAD-wide halo window for the conv (not needed at these shapes).

    kernel = functools.partial(_ms_sam_kernel, K=kernel_size, PAD=pad)
    return pl.pallas_call(
        kernel,
        out_shape=jax.ShapeDtypeStruct((N, C, L), jnp.float32),
        grid=grid,
        in_specs=[
            pl.BlockSpec((nb, C, L), lambda n: (n, 0, 0)),           # x slab
            pl.BlockSpec(memory_space=pltpu.MemorySpace.SMEM),       # conv weights
            pl.BlockSpec(memory_space=pltpu.MemorySpace.SMEM),       # conv bias
        ],
        out_specs=pl.BlockSpec((nb, C, L), lambda n: (n, 0, 0)),
        compiler_params=pltpu.CompilerParams(
            dimension_semantics=("parallel",),
            vmem_limit_bytes=vmem_limit,
        ),
        cost_estimate=cost,
    )(x, w_flat, b)


def _reference(x, weight, bias, pad):
    """Pure-JAX reference mirroring the PyTorch forward (for validation)."""
    avg = jnp.mean(x, axis=1, keepdims=True)
    mx = jnp.max(x, axis=1, keepdims=True)
    sam = jnp.concatenate([avg, mx], axis=1)                 # (N, 2, L)
    out = jax.lax.conv_general_dilated(
        sam, weight, window_strides=(1,), padding=[(pad, pad)],
        dimension_numbers=("NCH", "OIH", "NCH"))
    out = out + bias.reshape(1, 1, 1)
    return x * jax.nn.sigmoid(out)


if __name__ == "__main__":
    N, C, L = 6, 4, 128
    kernel_size, pad = 7, 3

    key = jax.random.PRNGKey(0)
    kx, kw, kb = jax.random.split(key, 3)
    x = jax.random.normal(kx, (N, C, L), dtype=jnp.float32)
    # Deterministic Conv1d parameter init (shapes from nn.Conv1d(2, 1, K, 1, pad)).
    fan_in = 2 * kernel_size
    bound = 1.0 / (fan_in ** 0.5)
    weight = jax.random.uniform(kw, (1, 2, kernel_size), jnp.float32, -bound, bound)
    bias = jax.random.uniform(kb, (1,), jnp.float32, -bound, bound)

    out = ms_sam_forward(x, weight, bias, kernel_size, pad)
    out = jax.block_until_ready(out)

    ref = _reference(x, weight, bias, pad)
    assert out.shape == (N, C, L)
    # Slightly relaxed tolerance: the sigmoid divide uses the EUP approximate
    # reciprocal (pl.reciprocal(..., approx=True)).
    assert jnp.allclose(out, ref, atol=5e-3, rtol=5e-3), "mismatch vs reference"
    print("KERNEL_OK")
</pallas_src>

<mosaic_0001>
module attributes {stable_mosaic.version = 11 : i64} {
  func.func @_ms_sam_kernel(%arg0: i32, %arg1: memref<3x4x128xf32, #tpu.memory_space<vmem>>, %arg2: memref<14xf32, #tpu.memory_space<smem>>, %arg3: memref<1xf32, #tpu.memory_space<smem>>, %arg4: memref<3x4x128xf32, #tpu.memory_space<vmem>>) attributes {dimension_semantics = [#tpu.dimension_semantics<parallel>], iteration_bounds = array<i64: 2>, scalar_prefetch = 0 : i64, scratch_operands = 0 : i64, tpu.core_type = #tpu.core_type<tc>, window_params = [{transform_indices = @transform_0, window_bounds = array<i64: 3, 4, 128>}, {transform_indices = @transform_1, window_bounds = array<i64: 14>}, {transform_indices = @transform_2, window_bounds = array<i64: 1>}, {transform_indices = @transform_3, window_bounds = array<i64: 3, 4, 128>}]} {
    %c0 = arith.constant 0 : index
    %c0_0 = arith.constant 0 : index
    %c0_1 = arith.constant 0 : index
    %0 = vector.load %arg1[%c0, %c0_0, %c0_1] : memref<3x4x128xf32, #tpu.memory_space<vmem>>, vector<3x4x128xf32>
    %cst = arith.constant dense<0.000000e+00> : vector<3x128xf32>
    %1 = vector.multi_reduction <add>, %0, %cst [1] : vector<3x4x128xf32> to vector<3x128xf32>
    %cst_2 = arith.constant 2.500000e-01 : f32
    %2 = vector.broadcast %cst_2 : f32 to vector<3x128xf32>
    %3 = arith.mulf %1, %2 : vector<3x128xf32>
    %cst_3 = arith.constant dense<0xFF800000> : vector<3x128xf32>
    %4 = vector.multi_reduction <maximumf>, %0, %cst_3 [1] : vector<3x4x128xf32> to vector<3x128xf32>
    %5 = tpu.concatenate %3, %4 in 0 : vector<3x128xf32>, vector<3x128xf32> -> vector<6x128xf32>
    %6 = tpu.iota {dimensions = array<i32: 1>} : vector<1x128xi32>
    %c0_4 = arith.constant 0 : index
    %7 = memref.load %arg3[%c0_4] : memref<1xf32, #tpu.memory_space<smem>>
    %8 = vector.broadcast %7 : f32 to vector<3x128xf32>
    %c3_i32 = arith.constant 3 : i32
    %9 = tpu.dynamic_rotate %5 by %c3_i32 dim 1 : vector<6x128xf32>, i32 -> vector<6x128xf32>
    %c-3_i32 = arith.constant -3 : i32
    %10 = vector.broadcast %c-3_i32 : i32 to vector<1x128xi32>
    %11 = arith.addi %6, %10 : vector<1x128xi32>
    %c0_i32 = arith.constant 0 : i32
    %12 = vector.broadcast %c0_i32 : i32 to vector<1x128xi32>
    %13 = arith.cmpi sge, %11, %12 : vector<1x128xi32>
    %c-3_i32_5 = arith.constant -3 : i32
    %14 = vector.broadcast %c-3_i32_5 : i32 to vector<1x128xi32>
    %15 = arith.addi %6, %14 : vector<1x128xi32>
    %c128_i32 = arith.constant 128 : i32
    %16 = vector.broadcast %c128_i32 : i32 to vector<1x128xi32>
    %17 = arith.cmpi slt, %15, %16 : vector<1x128xi32>
    %18 = arith.andi %13, %17 : vector<1x128xi1>
    %c0_6 = arith.constant 0 : index
    %19 = memref.load %arg2[%c0_6] : memref<14xf32, #tpu.memory_space<smem>>
    %20 = vector.extract_strided_slice %9 {offsets = [0, 0], sizes = [3, 128], strides = [1, 1]} : vector<6x128xf32> to vector<3x128xf32>
    %21 = vector.broadcast %19 : f32 to vector<3x128xf32>
    %22 = arith.mulf %21, %20 : vector<3x128xf32>
    %c7 = arith.constant 7 : index
    %23 = memref.load %arg2[%c7] : memref<14xf32, #tpu.memory_space<smem>>
    %24 = vector.extract_strided_slice %9 {offsets = [3, 0], sizes = [3, 128], strides = [1, 1]} : vector<6x128xf32> to vector<3x128xf32>
    %25 = vector.broadcast %23 : f32 to vector<3x128xf32>
    %26 = arith.mulf %25, %24 : vector<3x128xf32>
    %27 = arith.addf %22, %26 : vector<3x128xf32>
    %cst_7 = arith.constant 0.000000e+00 : f32
    %28 = vector.shape_cast %18 : vector<1x128xi1> to vector<1x128xi1>
    %29 = vector.broadcast %28 : vector<1x128xi1> to vector<3x128xi1>
    %30 = vector.broadcast %cst_7 : f32 to vector<3x128xf32>
    %31 = arith.select %29, %27, %30 : vector<3x128xi1>, vector<3x128xf32>
    %32 = arith.addf %8, %31 : vector<3x128xf32>
    %c2_i32 = arith.constant 2 : i32
    %33 = tpu.dynamic_rotate %5 by %c2_i32 dim 1 : vector<6x128xf32>, i32 -> vector<6x128xf32>
    %c-2_i32 = arith.constant -2 : i32
    %34 = vector.broadcast %c-2_i32 : i32 to vector<1x128xi32>
    %35 = arith.addi %6, %34 : vector<1x128xi32>
    %c0_i32_8 = arith.constant 0 : i32
    %36 = vector.broadcast %c0_i32_8 : i32 to vector<1x128xi32>
    %37 = arith.cmpi sge, %35, %36 : vector<1x128xi32>
    %c-2_i32_9 = arith.constant -2 : i32
    %38 = vector.broadcast %c-2_i32_9 : i32 to vector<1x128xi32>
    %39 = arith.addi %6, %38 : vector<1x128xi32>
    %c128_i32_10 = arith.constant 128 : i32
    %40 = vector.broadcast %c128_i32_10 : i32 to vector<1x128xi32>
    %41 = arith.cmpi slt, %39, %40 : vector<1x128xi32>
    %42 = arith.andi %37, %41 : vector<1x128xi1>
    %c1 = arith.constant 1 : index
    %43 = memref.load %arg2[%c1] : memref<14xf32, #tpu.memory_space<smem>>
    %44 = vector.extract_strided_slice %33 {offsets = [0, 0], sizes = [3, 128], strides = [1, 1]} : vector<6x128xf32> to vector<3x128xf32>
    %45 = vector.broadcast %43 : f32 to vector<3x128xf32>
    %46 = arith.mulf %45, %44 : vector<3x128xf32>
    %c8 = arith.constant 8 : index
    %47 = memref.load %arg2[%c8] : memref<14xf32, #tpu.memory_space<smem>>
    %48 = vector.extract_strided_slice %33 {offsets = [3, 0], sizes = [3, 128], strides = [1, 1]} : vector<6x128xf32> to vector<3x128xf32>
    %49 = vector.broadcast %47 : f32 to vector<3x128xf32>
    %50 = arith.mulf %49, %48 : vector<3x128xf32>
    %51 = arith.addf %46, %50 : vector<3x128xf32>
    %cst_11 = arith.constant 0.000000e+00 : f32
    %52 = vector.shape_cast %42 : vector<1x128xi1> to vector<1x128xi1>
    %53 = vector.broadcast %52 : vector<1x128xi1> to vector<3x128xi1>
    %54 = vector.broadcast %cst_11 : f32 to vector<3x128xf32>
    %55 = arith.select %53, %51, %54 : vector<3x128xi1>, vector<3x128xf32>
    %56 = arith.addf %32, %55 : vector<3x128xf32>
    %c1_i32 = arith.constant 1 : i32
    %57 = tpu.dynamic_rotate %5 by %c1_i32 dim 1 : vector<6x128xf32>, i32 -> vector<6x128xf32>
    %c-1_i32 = arith.constant -1 : i32
    %58 = vector.broadcast %c-1_i32 : i32 to vector<1x128xi32>
    %59 = arith.addi %6, %58 : vector<1x128xi32>
    %c0_i32_12 = arith.constant 0 : i32
    %60 = vector.broadcast %c0_i32_12 : i32 to vector<1x128xi32>
    %61 = arith.cmpi sge, %59, %60 : vector<1x128xi32>
    %c-1_i32_13 = arith.constant -1 : i32
    %62 = vector.broadcast %c-1_i32_13 : i32 to vector<1x128xi32>
    %63 = arith.addi %6, %62 : vector<1x128xi32>
    %c128_i32_14 = arith.constant 128 : i32
    %64 = vector.broadcast %c128_i32_14 : i32 to vector<1x128xi32>
    %65 = arith.cmpi slt, %63, %64 : vector<1x128xi32>
    %66 = arith.andi %61, %65 : vector<1x128xi1>
    %c2 = arith.constant 2 : index
    %67 = memref.load %arg2[%c2] : memref<14xf32, #tpu.memory_space<smem>>
    %68 = vector.extract_strided_slice %57 {offsets = [0, 0], sizes = [3, 128], strides = [1, 1]} : vector<6x128xf32> to vector<3x128xf32>
    %69 = vector.broadcast %67 : f32 to vector<3x128xf32>
    %70 = arith.mulf %69, %68 : vector<3x128xf32>
    %c9 = arith.constant 9 : index
    %71 = memref.load %arg2[%c9] : memref<14xf32, #tpu.memory_space<smem>>
    %72 = vector.extract_strided_slice %57 {offsets = [3, 0], sizes = [3, 128], strides = [1, 1]} : vector<6x128xf32> to vector<3x128xf32>
    %73 = vector.broadcast %71 : f32 to vector<3x128xf32>
    %74 = arith.mulf %73, %72 : vector<3x128xf32>
    %75 = arith.addf %70, %74 : vector<3x128xf32>
    %cst_15 = arith.constant 0.000000e+00 : f32
    %76 = vector.shape_cast %66 : vector<1x128xi1> to vector<1x128xi1>
    %77 = vector.broadcast %76 : vector<1x128xi1> to vector<3x128xi1>
    %78 = vector.broadcast %cst_15 : f32 to vector<3x128xf32>
    %79 = arith.select %77, %75, %78 : vector<3x128xi1>, vector<3x128xf32>
    %80 = arith.addf %56, %79 : vector<3x128xf32>
    %c0_i32_16 = arith.constant 0 : i32
    %81 = tpu.dynamic_rotate %5 by %c0_i32_16 dim 1 : vector<6x128xf32>, i32 -> vector<6x128xf32>
    %c0_i32_17 = arith.constant 0 : i32
    %82 = vector.broadcast %c0_i32_17 : i32 to vector<1x128xi32>
    %83 = arith.addi %6, %82 : vector<1x128xi32>
    %c0_i32_18 = arith.constant 0 : i32
    %84 = vector.broadcast %c0_i32_18 : i32 to vector<1x128xi32>
    %85 = arith.cmpi sge, %83, %84 : vector<1x128xi32>
    %c0_i32_19 = arith.constant 0 : i32
    %86 = vector.broadcast %c0_i32_19 : i32 to vector<1x128xi32>
    %87 = arith.addi %6, %86 : vector<1x128xi32>
    %c128_i32_20 = arith.constant 128 : i32
    %88 = vector.broadcast %c128_i32_20 : i32 to vector<1x128xi32>
    %89 = arith.cmpi slt, %87, %88 : vector<1x128xi32>
    %90 = arith.andi %85, %89 : vector<1x128xi1>
    %c3 = arith.constant 3 : index
    %91 = memref.load %arg2[%c3] : memref<14xf32, #tpu.memory_space<smem>>
    %92 = vector.extract_strided_slice %81 {offsets = [0, 0], sizes = [3, 128], strides = [1, 1]} : vector<6x128xf32> to vector<3x128xf32>
    %93 = vector.broadcast %91 : f32 to vector<3x128xf32>
    %94 = arith.mulf %93, %92 : vector<3x128xf32>
    %c10 = arith.constant 10 : index
    %95 = memref.load %arg2[%c10] : memref<14xf32, #tpu.memory_space<smem>>
    %96 = vector.extract_strided_slice %81 {offsets = [3, 0], sizes = [3, 128], strides = [1, 1]} : vector<6x128xf32> to vector<3x128xf32>
    %97 = vector.broadcast %95 : f32 to vector<3x128xf32>
    %98 = arith.mulf %97, %96 : vector<3x128xf32>
    %99 = arith.addf %94, %98 : vector<3x128xf32>
    %cst_21 = arith.constant 0.000000e+00 : f32
    %100 = vector.shape_cast %90 : vector<1x128xi1> to vector<1x128xi1>
    %101 = vector.broadcast %100 : vector<1x128xi1> to vector<3x128xi1>
    %102 = vector.broadcast %cst_21 : f32 to vector<3x128xf32>
    %103 = arith.select %101, %99, %102 : vector<3x128xi1>, vector<3x128xf32>
    %104 = arith.addf %80, %103 : vector<3x128xf32>
    %c127_i32 = arith.constant 127 : i32
    %105 = tpu.dynamic_rotate %5 by %c127_i32 dim 1 : vector<6x128xf32>, i32 -> vector<6x128xf32>
    %c1_i32_22 = arith.constant 1 : i32
    %106 = vector.broadcast %c1_i32_22 : i32 to vector<1x128xi32>
    %107 = arith.addi %6, %106 : vector<1x128xi32>
    %c0_i32_23 = arith.constant 0 : i32
    %108 = vector.broadcast %c0_i32_23 : i32 to vector<1x128xi32>
    %109 = arith.cmpi sge, %107, %108 : vector<1x128xi32>
    %c1_i32_24 = arith.constant 1 : i32
    %110 = vector.broadcast %c1_i32_24 : i32 to vector<1x128xi32>
    %111 = arith.addi %6, %110 : vector<1x128xi32>
    %c128_i32_25 = arith.constant 128 : i32
    %112 = vector.broadcast %c128_i32_25 : i32 to vector<1x128xi32>
    %113 = arith.cmpi slt, %111, %112 : vector<1x128xi32>
    %114 = arith.andi %109, %113 : vector<1x128xi1>
    %c4 = arith.constant 4 : index
    %115 = memref.load %arg2[%c4] : memref<14xf32, #tpu.memory_space<smem>>
    %116 = vector.extract_strided_slice %105 {offsets = [0, 0], sizes = [3, 128], strides = [1, 1]} : vector<6x128xf32> to vector<3x128xf32>
    %117 = vector.broadcast %115 : f32 to vector<3x128xf32>
    %118 = arith.mulf %117, %116 : vector<3x128xf32>
    %c11 = arith.constant 11 : index
    %119 = memref.load %arg2[%c11] : memref<14xf32, #tpu.memory_space<smem>>
    %120 = vector.extract_strided_slice %105 {offsets = [3, 0], sizes = [3, 128], strides = [1, 1]} : vector<6x128xf32> to vector<3x128xf32>
    %121 = vector.broadcast %119 : f32 to vector<3x128xf32>
    %122 = arith.mulf %121, %120 : vector<3x128xf32>
    %123 = arith.addf %118, %122 : vector<3x128xf32>
    %cst_26 = arith.constant 0.000000e+00 : f32
    %124 = vector.shape_cast %114 : vector<1x128xi1> to vector<1x128xi1>
    %125 = vector.broadcast %124 : vector<1x128xi1> to vector<3x128xi1>
    %126 = vector.broadcast %cst_26 : f32 to vector<3x128xf32>
    %127 = arith.select %125, %123, %126 : vector<3x128xi1>, vector<3x128xf32>
    %128 = arith.addf %104, %127 : vector<3x128xf32>
    %c126_i32 = arith.constant 126 : i32
    %129 = tpu.dynamic_rotate %5 by %c126_i32 dim 1 : vector<6x128xf32>, i32 -> vector<6x128xf32>
    %c2_i32_27 = arith.constant 2 : i32
    %130 = vector.broadcast %c2_i32_27 : i32 to vector<1x128xi32>
    %131 = arith.addi %6, %130 : vector<1x128xi32>
    %c0_i32_28 = arith.constant 0 : i32
    %132 = vector.broadcast %c0_i32_28 : i32 to vector<1x128xi32>
    %133 = arith.cmpi sge, %131, %132 : vector<1x128xi32>
    %c2_i32_29 = arith.constant 2 : i32
    %134 = vector.broadcast %c2_i32_29 : i32 to vector<1x128xi32>
    %135 = arith.addi %6, %134 : vector<1x128xi32>
    %c128_i32_30 = arith.constant 128 : i32
    %136 = vector.broadcast %c128_i32_30 : i32 to vector<1x128xi32>
    %137 = arith.cmpi slt, %135, %136 : vector<1x128xi32>
    %138 = arith.andi %133, %137 : vector<1x128xi1>
    %c5 = arith.constant 5 : index
    %139 = memref.load %arg2[%c5] : memref<14xf32, #tpu.memory_space<smem>>
    %140 = vector.extract_strided_slice %129 {offsets = [0, 0], sizes = [3, 128], strides = [1, 1]} : vector<6x128xf32> to vector<3x128xf32>
    %141 = vector.broadcast %139 : f32 to vector<3x128xf32>
    %142 = arith.mulf %141, %140 : vector<3x128xf32>
    %c12 = arith.constant 12 : index
    %143 = memref.load %arg2[%c12] : memref<14xf32, #tpu.memory_space<smem>>
    %144 = vector.extract_strided_slice %129 {offsets = [3, 0], sizes = [3, 128], strides = [1, 1]} : vector<6x128xf32> to vector<3x128xf32>
    %145 = vector.broadcast %143 : f32 to vector<3x128xf32>
    %146 = arith.mulf %145, %144 : vector<3x128xf32>
    %147 = arith.addf %142, %146 : vector<3x128xf32>
    %cst_31 = arith.constant 0.000000e+00 : f32
    %148 = vector.shape_cast %138 : vector<1x128xi1> to vector<1x128xi1>
    %149 = vector.broadcast %148 : vector<1x128xi1> to vector<3x128xi1>
    %150 = vector.broadcast %cst_31 : f32 to vector<3x128xf32>
    %151 = arith.select %149, %147, %150 : vector<3x128xi1>, vector<3x128xf32>
    %152 = arith.addf %128, %151 : vector<3x128xf32>
    %c125_i32 = arith.constant 125 : i32
    %153 = tpu.dynamic_rotate %5 by %c125_i32 dim 1 : vector<6x128xf32>, i32 -> vector<6x128xf32>
    %c3_i32_32 = arith.constant 3 : i32
    %154 = vector.broadcast %c3_i32_32 : i32 to vector<1x128xi32>
    %155 = arith.addi %6, %154 : vector<1x128xi32>
    %c0_i32_33 = arith.constant 0 : i32
    %156 = vector.broadcast %c0_i32_33 : i32 to vector<1x128xi32>
    %157 = arith.cmpi sge, %155, %156 : vector<1x128xi32>
    %c3_i32_34 = arith.constant 3 : i32
    %158 = vector.broadcast %c3_i32_34 : i32 to vector<1x128xi32>
    %159 = arith.addi %6, %158 : vector<1x128xi32>
    %c128_i32_35 = arith.constant 128 : i32
    %160 = vector.broadcast %c128_i32_35 : i32 to vector<1x128xi32>
    %161 = arith.cmpi slt, %159, %160 : vector<1x128xi32>
    %162 = arith.andi %157, %161 : vector<1x128xi1>
    %c6 = arith.constant 6 : index
    %163 = memref.load %arg2[%c6] : memref<14xf32, #tpu.memory_space<smem>>
    %164 = vector.extract_strided_slice %153 {offsets = [0, 0], sizes = [3, 128], strides = [1, 1]} : vector<6x128xf32> to vector<3x128xf32>
    %165 = vector.broadcast %163 : f32 to vector<3x128xf32>
    %166 = arith.mulf %165, %164 : vector<3x128xf32>
    %c13 = arith.constant 13 : index
    %167 = memref.load %arg2[%c13] : memref<14xf32, #tpu.memory_space<smem>>
    %168 = vector.extract_strided_slice %153 {offsets = [3, 0], sizes = [3, 128], strides = [1, 1]} : vector<6x128xf32> to vector<3x128xf32>
    %169 = vector.broadcast %167 : f32 to vector<3x128xf32>
    %170 = arith.mulf %169, %168 : vector<3x128xf32>
    %171 = arith.addf %166, %170 : vector<3x128xf32>
    %cst_36 = arith.constant 0.000000e+00 : f32
    %172 = vector.shape_cast %162 : vector<1x128xi1> to vector<1x128xi1>
    %173 = vector.broadcast %172 : vector<1x128xi1> to vector<3x128xi1>
    %174 = vector.broadcast %cst_36 : f32 to vector<3x128xf32>
    %175 = arith.select %173, %171, %174 : vector<3x128xi1>, vector<3x128xf32>
    %176 = arith.addf %152, %175 : vector<3x128xf32>
    %cst_37 = arith.constant 0.000000e+00 : f32
    %177 = vector.broadcast %cst_37 : f32 to vector<3x128xf32>
    %178 = arith.subf %177, %176 : vector<3x128xf32>
    %179 = math.exp %178 : vector<3x128xf32>
    %cst_38 = arith.constant 1.000000e+00 : f32
    %180 = vector.broadcast %cst_38 : f32 to vector<3x128xf32>
    %181 = arith.addf %180, %179 : vector<3x128xf32>
    %182 = tpu.reciprocal %181 {approx = true} : vector<3x128xf32> -> vector<3x128xf32>
    %183 = vector.shape_cast %182 : vector<3x128xf32> to vector<3x1x128xf32>
    %184 = vector.broadcast %183 : vector<3x1x128xf32> to vector<3x4x128xf32>
    %185 = arith.mulf %0, %184 : vector<3x4x128xf32>
    %c0_39 = arith.constant 0 : index
    %c0_40 = arith.constant 0 : index
    %c0_41 = arith.constant 0 : index
    %186 = vector.load %arg4[%c0_39, %c0_40, %c0_41] : memref<3x4x128xf32, #tpu.memory_space<vmem>>, vector<3x4x128xf32>
    tpu.vector_store %arg4[%c0_39, %c0_40, %c0_41], %185 {strides = array<i32>} : memref<3x4x128xf32, #tpu.memory_space<vmem>>, vector<3x4x128xf32>,
    return
  }
  func.func @transform_0(%arg0: i32) -> (i32, i32, i32) {
    %c0_i32 = arith.constant 0 : i32
    %c0_i32_0 = arith.constant 0 : i32
    %c0_i32_1 = arith.constant 0 : i32
    return %arg0, %c0_i32, %c0_i32_0 : i32, i32, i32
  }
  func.func @transform_1(%arg0: i32) -> i32 {
    %c0_i32 = arith.constant 0 : i32
    %c0_i32_0 = arith.constant 0 : i32
    return %c0_i32 : i32
  }
  func.func @transform_2(%arg0: i32) -> i32 {
    %c0_i32 = arith.constant 0 : i32
    %c0_i32_0 = arith.constant 0 : i32
    return %c0_i32 : i32
  }
  func.func @transform_3(%arg0: i32) -> (i32, i32, i32) {
    %c0_i32 = arith.constant 0 : i32
    %c0_i32_0 = arith.constant 0 : i32
    %c0_i32_1 = arith.constant 0 : i32
    return %arg0, %c0_i32, %c0_i32_0 : i32, i32, i32
  }
}

</mosaic_0001>

<bundles_post_ra>
// kernel: tpu_custom_call.1
= control target key start
LH: loop header
LB: loop body
LE: loop exit
PB: predicated region body
PF: predicated region fallthrough
CT: control target
= control target key end

     0   :  { %s1074_s0 = inlined_call_operand.hbm [shape: f32[6,4,128], index: 0, kind: input, shape index: {}]   ;;  %s1075_s1 = inlined_call_operand.vmem [shape: f32[14], index: 1, kind: input, shape index: {}]   ;;  %s1076_s2 = inlined_call_operand.<no memory space> [shape: f32[1], index: 2, kind: input, shape index: {}]   ;;  %s1077_s3 = inlined_call_operand.hbm [shape: f32[6,4,128], index: 3, kind: output, shape index: {}]  }
   0x1   :  { %8 = sst [smem:[#allocation2]] %s1076_s2 }
   0x2   :  { %9 = vsyncpa [#allocation4], 0 }
   0x3   :  { %11 = vsyncpa [#allocation4 + $0x1], 0 }
   0x4   :  { %12 = vsyncpa [#allocation6], 0 }
   0x5   :  { %13 = vsyncpa [#allocation5], 0 }
   0x6   :  { %15 = vsyncpa [#allocation5 + $0x1], 0  ;;  %s812_s14 = smov 0   ;;  %s814_s15 = smov 0  }
   0x7   :  { %s816_s16 = smov 0   ;;  %s818_s17 = smov 0  }
   0x8 LB: > { %s833_s2 = sadd.s32 4294967295, %s773_s17   ;;  %s563_s18 = sadd.s32 4294967294, %s773_s17   ;;  %s773_s17 = sphi %s818_s17, %s1099_s17   ;;  %s769_s16 = sphi %s816_s16, %s1098_s16   ;;  %s765_s15 = sphi %s814_s15, %s1097_s15   ;;  %s761_s14 = sphi %s812_s14, %s1096_s14  }
   0x9   : > { %s837_s19 = sadd.s32 1, %s773_s17   ;;  %s28_s20 = sadd.s32 1, %s769_s16 }
   0xa   : > { %s25_s21 = ssub.s32 %s773_s17, %s837_s19  ;;  %p35_p0 = scmp.ne.s32.totalorder %s769_s16, %s765_s15 }
   0xb   : > { %p26_p1 = scmp.eq.s32.totalorder %s25_s21, 0  ;;  %p36_p2 = scmp.eq.s32.totalorder %s773_s17, 0 }
   0xc   : > { %p41_p3 = scmp.ne.s32.totalorder %s765_s15, %s761_s14  ;;  %p1079_p4 = scmp.eq.s32.totalorder %s833_s2, 0 }
   0xd   : > { %s849_s22 = scalar_select %p26_p1, %s769_s16, %s28_s20  }
   0xe   : > { %p851_p5 = por %p36_p2, %p35_p0  ;;  %p857_p6 = por %p1079_p4, %p41_p3 }
   0xf   : > { %p107_p7 = scmp.eq.s32.totalorder %s833_s2, 1  ;;  %p113_p8 = scmp.eq.s32.totalorder %s563_s18, 1 }
  0x10   : > { %s1083_s24 = scalar_select %p857_p6, 1, 0 }
  0x11   : > { %p564_p9 = scmp.ge.s32.totalorder %s773_s17, 1  ;;  %p120_p10 = scmp.lt.s32.totalorder %s773_s17, 3 }
  0x12   : > { %p864_p11 = por %p107_p7, %p35_p0  ;;  %p868_p12 = por %p113_p8, %p41_p3 }
  0x13   : > { %p872_p13 = pnand %p564_p9, %p120_p10  ;;  %s133_s30 = sshll.u32 %s1075_s1, 4  ;;  %s134_s30 = int_to_ptr.vmem [resolvable:$true] %s133_s30 }
  0x14   : > { %s1084_s25 = scalar_select %p864_p11, 1, 0 }
  0x15   : > { %s1085_s26 = scalar_select %p868_p12, 1, 0 }
  0x16   : > { %s1086_s27 = scalar_select %p872_p13, 1, 0 }
  0x17   : > { %p598_p1 = pneg %p872_p13  ;;  %p611_p2 = scmp.lt.s32.totalorder %s773_s17, 2 }
  0x18   : > { %s147_s5 = sand.u32 1, %s769_s16   ;;  %s662_s8 = scalar_lea.vmem %s134_s30, 16 }
  0x19   : > { %p885_p7 = pnand %p598_p1, %p1079_p4  ;;  %p892_p3 = pnand %p611_p2, %p851_p5 }
  0x1a   : > { %s588_s7 = smul.u32 12, %s147_s5  ;;  %p663_p8 = scmp.ne.s32.totalorder %s134_s30, %s662_s8 }
  0x1b   : > { %p664_p9 = pneg %p885_p7  ;;  %p670_p12 = scmp.lt.s32.totalorder %s134_s30, %s134_s30 }
  0x1c   : > { %p671_p11 = scmp.lt.s32.totalorder %s662_s8, %s662_s8 }
  0x1d   : > { %p665_p10 = pnand %p664_p9, %p663_p8 }
  0x1e   : > { %p672_p1 = por %p671_p11, %p670_p12 }
  0x1f   : > { %p666_p0 = pneg %p665_p10 }
  0x21   : > { %p673_p4 = pnand %p672_p1, %p666_p0 }
  0x23   : > { %676 = shalt.err (!%p673_p4)
}
  0x24   : > { %s775_s9 = smov [#allocation7]   ;;  %s586_s10 = smul.u32 192, %s773_s17 }
  0x25   : > { %601 = dma.vmem_to_smem (!%p885_p7), %s134_s30, 16, %s775_s9, [#allocation6]  }
  0x26   : > { %s151_s11 = scalar_lea.vmem [#allocation3], %s588_s7  ;;  %s906_s20 = scalar_lea.hbm %s1074_s0, %s586_s10 }
  0x27   : > { %s158_s12 = sshll.u32 %s151_s11, 4  ;;  %s908_s21 = scalar_lea.sflag [#allocation4], %s147_s5  ;;  %s901_s12 = int_to_ptr.vmem [resolvable:$true] %s158_s12 }
  0x28   : > { %s677_s23 = scalar_lea.hbm %s906_s20, 192  ;;  %p679_p5 = pneg %p892_p3 }
  0x29   : > { %p678_p4 = scmp.ne.s32.totalorder %s906_s20, %s677_s23  ;;  %s682_s30 = scalar_lea.hbm %s1074_s0, 384 }
  0x2a   : > { %p683_p0 = scmp.lt.s32.totalorder %s906_s20, %s1074_s0  ;;  %p684_p2 = scmp.lt.s32.totalorder %s682_s30, %s677_s23 }
  0x2b   : > { %p680_p11 = pnand %p679_p5, %p678_p4 }
  0x2c   : > { %p685_p7 = por %p684_p2, %p683_p0 }
  0x2d   : > { %p681_p12 = pneg %p680_p11 }
  0x2f   : > { %p686_p8 = pnand %p685_p7, %p681_p12 }
  0x31   : > { %689 = shalt.err (!%p686_p8)
}
  0x32   : > { %s690_s5 = scalar_lea.vmem %s901_s12, 192  ;;  %s776_s8 = smov [#allocation3]  }
  0x33   : > { %p691_p9 = scmp.ne.s32.totalorder %s901_s12, %s690_s5  ;;  %s695_s9 = sshll.u32 %s776_s8, 4  ;;  %s696_s9 = int_to_ptr.vmem [resolvable:$false] %s695_s9 }
  0x34   : > { %s697_s10 = scalar_lea.vmem %s696_s9, 384  ;;  %p698_p4 = scmp.lt.s32.totalorder %s901_s12, %s696_s9 }
  0x35   : > { %p693_p10 = pnand %p691_p9, %p679_p5  ;;  %p699_p11 = scmp.lt.s32.totalorder %s697_s10, %s690_s5 }
  0x37   : > { %p694_p1 = pneg %p693_p10  ;;  %p700_p6 = por %p699_p11, %p698_p4 }
  0x39   : > { %p701_p13 = pnand %p700_p6, %p694_p1 }
  0x3b   : > { %704 = shalt.err (!%p701_p13)
}
  0x3c   : > { %s777_s11 = smov 64   ;;  %s778_s13 = smov 4  }
  0x3d   : > { %605 = dma.hbm_to_vmem [thread:$0]  (!%p892_p3), %s906_s20, 192, %s901_s12, %s908_s21, %s777_s11, %s777_s11, %s778_s13  }
  0x3e   : > { %p1089_p5 = scmp.ne.s32.totalorder %s1086_s27, 0 }
  0x3f   : > { %s932_s18 = sand.u32 (!%p1089_p5), 1, %s765_s15   ;;  %p1090_p6 = scmp.ne.s32.totalorder (!%p1089_p5), %s1083_s24, 0 }
  0x40   : > { %170 = sbr.rel (%p1089_p5) target bundleno = 293 (0x125), region = 32  ;;  %s173_s28 = scalar_lea.sflag (!%p1089_p5), [#allocation4], %s932_s18 }
  0x41   : > { %s589_s23 = smul.u32 (!%p1089_p5), 12, %s932_s18 }
  0x43   : > { %s176_s29 = scalar_lea.vmem (!%p1089_p5), [#allocation3], %s589_s23 }
  0x45   : > { %748 = dma.done.wait (%p1090_p6), %s173_s28, 192  }
  0x46   : > { %750 = vsyncadd (%p1090_p6), %s173_s28, 4294967104  ;;  %p1091_p13 = scmp.eq.s32.totalorder %s833_s2, 0 }
  0x48   : > { %752 = dma.done.wait (%p1091_p13), [#allocation6], 16   ;;  %p1092_p3 = pmov %p1091_p13 }
  0x4a   : > { %754 = vsyncadd (%p1092_p3), [#allocation6], 4294967280 }
  0x4b   : > { %185 = sfence }
  0x4c   : > { %v946_v0 = vld [vmem:[%s176_s29] sm:$0xf]  ;;  %v948_v1 = vld [vmem:[%s176_s29 + $0x4] sm:$0xf]  ;;  %v950_v2 = vld [vmem:[%s176_s29 + $0x8] sm:$0xf]  ;;  %v273_v53 = vlaneseq }
  0x4d   : > { %vm209_vm0 = vcmask 1043456   ;;  %vm258_vm1 = vcmask 1041409   ;;  %vm260_vm2 = vcmask 1042434   ;;  %vm266_vm3 = vcmask 1044484   ;;  %s779_s24 = smov 3   ;;  %s780_s27 = smov 1  }
  0x4e   : > { %v210_v3 = vsel %vm209_vm0, %v946_v0, 0.0  ;;  %v217_v4 = vsel %vm209_vm0, %v948_v1, 0.0  ;;  %v224_v5 = vsel %vm209_vm0, %v950_v2, 0.0  ;;  %v234_v6 = vsel %vm209_vm0, %v946_v0, -inf  ;;  %s781_s6 = smov 2   ;;  %s782_s12 = smov 127  }
  0x4f   : > { %v211_v7 = vrot.slane %v210_v3, 4  ;;  %v218_v8 = vrot.slane %v217_v4, 4  ;;  %v225_v9 = vrot.slane %v224_v5, 4  ;;  %v235_v10 = vrot.slane %v234_v6, 4  ;;  %s783_s20 = smov 126   ;;  %s784_s21 = smov 125  }
  0x50   : > { %v241_v11 = vsel %vm209_vm0, %v948_v1, -inf  ;;  %v248_v12 = vsel %vm209_vm0, %v950_v2, -inf  ;;  %vm268_vm4 = vcmask 1045509   ;;  %vm271_vm5 = vcmask 1042432   ;;  %s966_s30 = sld [smem:[#allocation2]]  ;;  %p1093_p0 = scmp.ne.s32.totalorder %s1084_s25, 0 }
  0x51   : > { %v212_v13 = vadd.f32 %v211_v7, %v210_v3  ;;  %v219_v14 = vadd.f32 %v218_v8, %v217_v4  ;;  %v226_v15 = vadd.f32 %v225_v9, %v224_v5  ;;  %v236_v16 = vmax.f32 %v234_v6, %v235_v10  ;;  %s968_s4 = sld [smem:[#allocation7]] }
  0x52   : > { %v242_v17 = vrot.slane %v241_v11, 4  ;;  %v249_v18 = vrot.slane %v248_v12, 4  ;;  %s570_s7 = sld [smem:[#allocation7 + $0x7]]  ;;  %v979_v54 = vand.u32 127, %v273_v53 }
  0x53   : > { %v213_v19 = vrot.slane %v212_v13, 2  ;;  %v220_v20 = vrot.slane %v219_v14, 2  ;;  %v227_v21 = vrot.slane %v226_v15, 2  ;;  %v237_v22 = vrot.slane %v236_v16, 2  ;;  %s574_s5 = sld [smem:[#allocation7 + $0x9]] }
  0x54   : > { %v243_v23 = vmax.f32 %v241_v11, %v242_v17  ;;  %v250_v24 = vmax.f32 %v248_v12, %v249_v18  ;;  %s970_s8 = sld [smem:[#allocation7 + $0x2]]  ;;  %v279_v57 = vadd.s32 4294967293, %v979_v54  ;;  %v319_v63 = vadd.s32 4294967295, %v979_v54 }
  0x55   : > { %v214_v25 = vadd.f32 %v213_v19, %v212_v13  ;;  %v221_v26 = vadd.f32 %v220_v20, %v219_v14  ;;  %v228_v27 = vadd.f32 %v227_v21, %v226_v15  ;;  %v238_v28 = vmax.f32 %v236_v16, %v237_v22  ;;  %s972_s9 = sld [smem:[#allocation7 + $0x1]] }
  0x56   : > { %v244_v29 = vrot.slane %v243_v23, 2  ;;  %v251_v30 = vrot.slane %v250_v24, 2  ;;  %s974_s10 = sld [smem:[#allocation7 + $0xa]]  ;;  %v276_v5 = vstv %s966_s30  ;;  %v299_v6 = vadd.s32 4294967294, %v979_v54 }
  0x57   : > { %v215_v31 = vrot.slane %v214_v25, 1  ;;  %v222_v32 = vrot.slane %v221_v26, 1  ;;  %v229_v33 = vrot.slane %v228_v27, 1  ;;  %v239_v34 = vrot.slane %v238_v28, 1  ;;  %s976_s11 = sld [smem:[#allocation7 + $0x8]] }
  0x58   : > { %v245_v35 = vmax.f32 %v243_v23, %v244_v29  ;;  %v252_v36 = vmax.f32 %v250_v24, %v251_v30  ;;  %s981_s13 = sld [smem:[#allocation7 + $0xb]]  ;;  %v287_v55 = vstv %s570_s7  ;;  %v284_v58 = vstv %s968_s4 }
  0x59   : > { %v216_v37 = vadd.f32 %v215_v31, %v214_v25  ;;  %v223_v38 = vadd.f32 %v222_v32, %v221_v26  ;;  %v230_v39 = vadd.f32 %v229_v33, %v228_v27  ;;  %v240_v40 = vmax.f32 %v238_v28, %v239_v34  ;;  %s983_s28 = sld [smem:[#allocation7 + $0x3]] }
  0x5a   : > { %v246_v41 = vrot.slane %v245_v35, 1  ;;  %v253_v42 = vrot.slane %v252_v36, 1  ;;  %s985_s29 = sld [smem:[#allocation7 + $0x4]]  ;;  %v327_v56 = vstv %s574_s5  ;;  %v324_v60 = vstv %s970_s8  ;;  %s786_s8 = smov [#allocation8]  }
  0x5b   : > { %v231_v43 = vmul.f32 0.25, %v216_v37  ;;  %v232_v44 = vmul.f32 0.25, %v223_v38  ;;  %v233_v45 = vmul.f32 0.25, %v230_v39  ;;  %vm280_vm6 = vcmp.ge.s32.totalorder %v279_v57, 0 }
  0x5c   : > { %v247_v46 = vmax.f32 %v245_v35, %v246_v41  ;;  %v254_v47 = vmax.f32 %v252_v36, %v253_v42  ;;  %v344_v4 = vstv %s974_s10  ;;  %v304_v13 = vstv %s972_s9  ;;  %s709_s9 = sshll.u32 %s786_s8, 4  ;;  %s710_s9 = int_to_ptr.vmem [resolvable:$false] %s709_s9 }
  0x5d   : > { %v259_v48 = vsel %vm258_vm1, %v232_v44, %v231_v43  ;;  %v307_v7 = vstv %s976_s11  ;;  %vm320_vm7 = vcmp.ge.s32.totalorder %v319_v63, 0  ;;  %vm300_vm8 = vcmp.ge.s32.totalorder %v299_v6, 0  ;;  %s711_s10 = scalar_lea.vmem %s710_s9, 384 }
  0x5e   : > { %v261_v49 = vsel %vm260_vm2, %v233_v45, %v259_v48  ;;  %v267_v50 = vsel %vm266_vm3, %v247_v46, %v240_v40  ;;  %v364_v10 = vstv %s981_s13  ;;  %v356_v38 = vadd.s32 1, %v979_v54 }
  0x5f   : > { %v269_v51 = vsel %vm268_vm4, %v254_v47, %v267_v50  ;;  %v341_v19 = vstv %s983_s28  ;;  %v376_v46 = vadd.s32 2, %v979_v54 }
  0x60   : > { %v958_v52 = vsel %vm271_vm5, %v261_v49, %v269_v51  ;;  %v361_v20 = vstv %s985_s29  ;;  %vm358_vm9 = vcmp.lt.s32.totalorder %v356_v38, 128 }
  0x61   : > { %277 = vrot.lane.b32.xlu0 %v958_v52, %s779_s24  ;;  %317 = vrot.lane.b32.xlu1 %v958_v52, %s780_s27  ;;  %s987_s24 = sld [smem:[#allocation7 + $0xc]]  ;;  %v345_v16 = vmul.f32 %v344_v4, %v958_v52  ;;  %v342_v28 = vmul.f32 %v341_v19, %v958_v52  ;;  %vm378_vm10 = vcmp.lt.s32.totalorder %v376_v46, 128 }
  0x62   : > { %s990_s27 = sld [smem:[#allocation7 + $0xd]] }
  0x63   : > { %v347_v29 = vrot.slane %v345_v16, 3 }
  0x65   : > { %297 = vrot.lane.b32.xlu0 %v958_v52, %s781_s6  ;;  %354 = vrot.lane.b32.xlu1 %v958_v52, %s782_s12  ;;  %s994_s6 = sld [smem:[#allocation7 + $0x5]]  ;;  %v349_v45 = vadd.f32 %v347_v29, %v342_v28 }
  0x66   : > { %s1001_s12 = sld [smem:[#allocation7 + $0x6]] }
  0x67   : > { %v384_v22 = vstv %s987_s24 }
  0x68   : > { %v404_v26 = vstv %s990_s27 }
  0x69   : > { %374 = vrot.lane.b32.xlu0 %v958_v52, %s783_s20  ;;  %394 = vrot.lane.b32.xlu1 %v958_v52, %s784_s21  ;;  %v396_v52 = vadd.s32 3, %v979_v54  ;;  %v785_v54 = vmov 1966171168   ;;  %s587_s20 = smul.u32 192, %s833_s2  ;;  %s203_s21 = scalar_lea.vmem [#allocation8], %s589_s23 }
  0x6a   : > { %s478_s30 = sshll.u32 %s203_s21, 4  ;;  %s465_s2 = scalar_lea.sflag [#allocation5], %s932_s18  ;;  %s1029_s30 = int_to_ptr.vmem [resolvable:$true] %s478_s30 }
  0x6b   : > { %v381_v30 = vstv %s994_s6  ;;  %vm398_vm11 = vcmp.lt.s32.totalorder %v396_v52, 128  ;;  %s1027_s5 = scalar_lea.hbm %s1077_s3, %s587_s20  ;;  %s705_s23 = scalar_lea.vmem %s1029_s30, 192 }
  0x6c   : > { %v401_v39 = vstv %s1001_s12  ;;  %p706_p12 = scmp.ne.s32.totalorder %s1029_s30, %s705_s23  ;;  %p712_p8 = scmp.lt.s32.totalorder %s1029_s30, %s710_s9 }
  0x6d   : > { %p713_p9 = scmp.lt.s32.totalorder %s711_s10, %s705_s23 }
  0x6e   : > { %p707_p2 = pnand %p706_p12, %p1093_p0 }
  0x6f   : > { %p714_p10 = por %p713_p9, %p712_p8 }
  0x70   : > { %p708_p7 = pneg %p707_p2 }
  0x72   : > { %p715_p1 = pnand %p714_p10, %p708_p7 }
  0xd3   : > { %v278_v59 = vpop.permute.xlu0 %277  ;;  %v318_v61 = vpop.permute.xlu1 %317 }
  0xd4   : > { %v288_v62 = vmul.f32 %v287_v55, %v278_v59  ;;  %v328_v3 = vmul.f32 %v327_v56, %v318_v61  ;;  %v285_v8 = vmul.f32 %v284_v58, %v278_v59  ;;  %v325_v11 = vmul.f32 %v324_v60, %v318_v61 }
  0xd6   : > { %v290_v9 = vrot.slane %v288_v62, 3  ;;  %v330_v12 = vrot.slane %v328_v3, 3 }
  0xd7   : > { %v298_v14 = vpop.permute.xlu0 %297  ;;  %v355_v15 = vpop.permute.xlu1 %354 }
  0xd8   : > { %v292_v17 = vadd.f32 %v290_v9, %v285_v8  ;;  %v308_v18 = vmul.f32 %v307_v7, %v298_v14  ;;  %v365_v21 = vmul.f32 %v364_v10, %v355_v15  ;;  %v305_v24 = vmul.f32 %v304_v13, %v298_v14 }
  0xd9   : > { %v332_v27 = vadd.f32 %v330_v12, %v325_v11  ;;  %v362_v34 = vmul.f32 %v361_v20, %v355_v15  ;;  %v421_v7 = vunpack.c.l.s4 %v785_v54  ;;  %v424_v9 = vshrl.u32 %v273_v53, 7 }
  0xda   : > { %v295_v23 = vsel %vm280_vm6, %v292_v17, 0.0  ;;  %v310_v25 = vrot.slane %v308_v18, 3  ;;  %v367_v35 = vrot.slane %v365_v21, 3 }
  0xdb   : > { %v375_v31 = vpop.permute.xlu0 %374  ;;  %v395_v32 = vpop.permute.xlu1 %394  ;;  %v296_v37 = vadd.f32 %v295_v23, %v276_v5  ;;  %v335_v47 = vsel %vm320_vm7, %v332_v27, 0.0  ;;  %v422_v8 = vunpack.c.0.s8 %v421_v7  ;;  %v445_v13 = vsub.s32 0, %v424_v9 }
  0xdc   : > { %v312_v33 = vadd.f32 %v310_v25, %v305_v24  ;;  %v385_v36 = vmul.f32 %v384_v22, %v375_v31  ;;  %v405_v40 = vmul.f32 %v404_v26, %v395_v32  ;;  %v382_v42 = vmul.f32 %v381_v30, %v375_v31 }
  0xdd   : > { %v369_v48 = vadd.f32 %v367_v35, %v362_v34  ;;  %v402_v49 = vmul.f32 %v401_v39, %v395_v32  ;;  %v425_v10 = vsub.s32 %v422_v8, %v424_v9 }
  0xde   : > { %v315_v41 = vsel %vm300_vm8, %v312_v33, 0.0  ;;  %v387_v43 = vrot.slane %v385_v36, 3  ;;  %v407_v50 = vrot.slane %v405_v40, 3 }
  0xdf   : > { %v316_v44 = vadd.f32 %v315_v41, %v296_v37  ;;  %v372_v57 = vsel %vm358_vm9, %v369_v48, 0.0 }
  0xe0   : > { %v389_v55 = vadd.f32 %v387_v43, %v382_v42  ;;  %v409_v58 = vadd.f32 %v407_v50, %v402_v49 }
  0xe1   : > { %v336_v51 = vadd.f32 %v335_v47, %v316_v44 }
  0xe2   : > { %v392_v60 = vsel %vm378_vm10, %v389_v55, 0.0  ;;  %v412_v62 = vsel %vm398_vm11, %v409_v58, 0.0 }
  0xe3   : > { %v353_v56 = vadd.f32 %v349_v45, %v336_v51 }
  0xe5   : > { %v373_v59 = vadd.f32 %v372_v57, %v353_v56 }
  0xe7   : > { %v393_v61 = vadd.f32 %v392_v60, %v373_v59 }
  0xe9   : > { %v413_v3 = vadd.f32 %v412_v62, %v393_v61 }
  0xeb   : > { %v414_v63 = vsub.f32 0.0, %v413_v3 }
  0xed   : > { %v415_v4 = vmul.f32 1.442695, %v414_v63 }
  0xef   : > { %658 = vpow2.f32 %v415_v4 }
  0xfc   : > { %v659_v5 = vpop.eup %658 }
  0xfd   : > { %v417_v6 = vadd.f32 1.0, %v659_v5 }
  0xff   : > { %660 = vrcp.f32 %v417_v6 }
 0x10c   : > { %v661_v11 = vpop.eup %660 }
 0x10d   : > { %v426_v12 = vrot.slane %v661_v11, %v425_v10 }
 0x10f   : > { %v427_v14 = vcombine.high %v426_v12, %v426_v12  ;;  %v434_v15 = vrot.slane %v426_v12, %v425_v10 }
 0x111   : > { %v441_v16 = vrot.slane %v427_v14, %v425_v10  ;;  %v442_v17 = vcombine.high %v434_v15, %v434_v15  ;;  %v446_v18 = vrot.slane %v434_v15, %v445_v13 }
 0x113   : > { %v450_v19 = vrot.slane %v441_v16, %v445_v13  ;;  %v454_v20 = vrot.slane %v442_v17, %v445_v13  ;;  %v458_v21 = vmul.f32 %v446_v18, %v946_v0 }
 0x115   : > { %v459_v53 = vmul.f32 %v450_v19, %v948_v1  ;;  %v460_v22 = vmul.f32 %v454_v20, %v950_v2  ;;  %461 = vst [vmem:[%s203_s21] sm:$0xf] %v458_v21 }
 0x117   : > { %462 = vst [vmem:[%s203_s21 + $0x4] sm:$0xf] %v459_v53  ;;  %463 = vst [vmem:[%s203_s21 + $0x8] sm:$0xf] %v460_v22 }
 0x118   : > { %718 = shalt.err (!%p715_p1)
}
 0x119   : > { %s719_s11 = scalar_lea.hbm %s1027_s5, 192  ;;  %s723_s29 = scalar_lea.hbm %s1077_s3, 384 }
 0x11a   : > { %p720_p4 = scmp.ne.s32.totalorder %s1027_s5, %s719_s11  ;;  %p724_p6 = scmp.lt.s32.totalorder %s1027_s5, %s1077_s3 }
 0x11b   : > { %p725_p13 = scmp.lt.s32.totalorder %s723_s29, %s719_s11 }
 0x11c   : > { %p721_p11 = pnand %p720_p4, %p1093_p0 }
 0x11d   : > { %p726_p3 = por %p725_p13, %p724_p6 }
 0x11e   : > { %p722_p5 = pneg %p721_p11 }
 0x120   : > { %p727_p12 = pnand %p726_p3, %p722_p5 }
 0x122   : > { %730 = shalt.err (!%p727_p12)
}
 0x123   : > { %s787_s6 = smov 64   ;;  %s788_s12 = smov 4  }
 0x124   : > { %596 = dma.vmem_to_hbm [thread:$0]  (%p1093_p0), %s1029_s30, 192, %s1027_s5, %s465_s2, %s787_s6, %s787_s6, %s788_s12  }
 0x125 PF: > { %s493_s20 = sand.u32 1, %s761_s14   ;;  %p1094_p2 = scmp.ne.s32.totalorder %s1085_s26, 0 }
 0x126   : > { %p1095_p7 = scmp.ge.s32.totalorder %s773_s17, 2  ;;  %s494_s21 = scalar_lea.sflag [#allocation5], %s493_s20 }
 0x128   : > { %p607_p8 = pnand %p1095_p7, %p1094_p2 }
 0x12a   : > { %p608_p9 = pneg %p607_p8 }
 0x12c   : > { %756 = dma.done.wait (%p608_p9), %s494_s21, 192  }
 0x12d   : > { %758 = vsyncadd (%p608_p9), %s494_s21, 4294967104  ;;  %p18_p10 = scmp.ge.s32.totalorder %s837_s19, 4   ;;  %s1096_s14 = smov %s765_s15 }
 0x12e   : > { %s1097_s15 = smov %s769_s16  ;;  %s1098_s16 = smov %s849_s22 }
 0x12f   : > { %s1099_s17 = smov %s837_s19  ;;  %20 = sbr.rel (!%p18_p10) target bundleno = 8 (0x8), region = 82 }
 0x134   :  { %499 = vsyncpa [#allocation4], 1 }
 0x135   :  { %501 = vsyncpa [#allocation4 + $0x1], 1 }
 0x136   :  { %502 = vsyncpa [#allocation5], 1 }
 0x137   :  { %504 = vsyncpa [#allocation5 + $0x1], 1 }
 0x138   :  { %505 = vsyncpa [#allocation6], 1 }
 0x139   :  { %507 = vsyncpa [#allocation6 + $0x1], 1 }

</bundles_post_ra>
